<compile_context>
chip_gen: v7x
topology: tpu7x:2x2x1
jax: 0.10.0
libtpu: 0.0.40
codegen_flags: <defaults>
</compile_context>

<pallas_src>
import functools

import jax
import jax.numpy as jnp
from jax.experimental import pallas as pl
from jax.experimental.pallas import tpu as pltpu


def _round_up(n, m):
    return ((n + m - 1) // m) * m


def _proposal_discrete_kernel(x_ref, w1_ref, b1_ref, w2_ref, b2_ref, out_ref,
                              *, softmax_boost, valid_out):
    # x tile: [TB, D_in_pad] bf16. Weights are whole-array VMEM residents (bf16),
    # biases f32. All accumulation and the softmax math are done in f32.
    x = x_ref[...]

    # lin1 + ReLU   (MXU matmul: bf16 operands, f32 accumulation)
    h = jnp.dot(x, w1_ref[...], preferred_element_type=jnp.float32) + b1_ref[...]
    h = jnp.maximum(h, 0.0)

    # lin2 (+ optional softmax_boost scale; skipped when boost == 1.0)
    logits = jnp.dot(h.astype(w2_ref.dtype), w2_ref[...],
                     preferred_element_type=jnp.float32) + b2_ref[...]
    if softmax_boost != 1.0:
        logits = logits * softmax_boost

    # Padded lanes (>= valid_out) must not contribute to the softmax denominator.
    # Skip entirely when the output dim already fills the lane width.
    if valid_out != logits.shape[-1]:
        lane = jax.lax.broadcasted_iota(jnp.int32, (1, logits.shape[-1]), 1)
        logits = jnp.where(lane < valid_out, logits, -jnp.inf)

    # Numerically-stable softmax over the feature (lane) axis.
    m = jnp.max(logits, axis=-1, keepdims=True)
    e = jnp.exp(logits - m)
    denom = jnp.sum(e, axis=-1, keepdims=True)
    out_ref[...] = (e * pl.reciprocal(denom, approx=True)).astype(out_ref.dtype)


def prepare_params(w1, b1, w2, b2):
    """One-time parameter prep (do NOT call per forward pass).

    w1: [D_in, D_in] (PyTorch [out, in]); w2: [D_out, D_in]; b1: [D_in]; b2: [D_out].
    Returns lane-padded, pre-transposed, bf16 weights + f32 biases."""
    d_in = w1.shape[1]
    d_out = w2.shape[0]
    d_in_p = _round_up(d_in, 128)
    d_out_p = _round_up(d_out, 128)

    w1t = jnp.zeros((d_in_p, d_in_p), jnp.float32).at[:d_in, :d_in].set(
        jnp.asarray(w1, jnp.float32).T)
    w2t = jnp.zeros((d_in_p, d_out_p), jnp.float32).at[:d_in, :d_out].set(
        jnp.asarray(w2, jnp.float32).T)
    b1p = jnp.zeros((1, d_in_p), jnp.float32).at[0, :d_in].set(
        jnp.asarray(b1, jnp.float32))
    b2p = jnp.zeros((1, d_out_p), jnp.float32).at[0, :d_out].set(
        jnp.asarray(b2, jnp.float32))

    return dict(w1=w1t.astype(jnp.bfloat16), b1=b1p,
                w2=w2t.astype(jnp.bfloat16), b2=b2p,
                d_in=d_in, d_out=d_out)


def proposal_discrete_forward(x, params, *, softmax_boost=1.0, block_b=256):
    """x: [B, D_in] float. params: output of prepare_params.
    Returns (True, probs[B, D_out]) matching ProposalDiscrete.forward."""
    B, d_in = x.shape
    assert d_in == params["d_in"], "x feature dim does not match params"
    d_out = params["d_out"]
    d_in_p = params["w1"].shape[0]
    d_out_p = params["w2"].shape[1]

    # Batch tiling: fat tiles amortize the ~0.35us/step pipeline overhead, but keep
    # >= 2 grid steps when possible so dual-TensorCore chips (v7x) use both cores.
    b_pad_min = _round_up(B, 8)
    blk = _round_up(min(max(block_b, 8), b_pad_min), 8)
    if b_pad_min // blk < 2 and b_pad_min >= 16:
        blk = _round_up(pl.cdiv(b_pad_min, 2), 8)
    B_pad = _round_up(B, blk)
    grid = B_pad // blk

    # Pad batch + features with zeros and cast activations to bf16 for the MXU.
    x_p = jnp.zeros((B_pad, d_in_p), jnp.bfloat16)
    x_p = x_p.at[:B, :d_in].set(jnp.asarray(x, jnp.float32).astype(jnp.bfloat16))

    # VMEM budget: residents (single-buffered) + double-buffered x/out tiles.
    resident = (params["w1"].size + params["w2"].size) * 2 \
        + (params["b1"].size + params["b2"].size) * 4
    streamed = 2 * blk * d_in_p * 2 + 2 * blk * d_out_p * 4
    vmem_est = int((resident + streamed) * 3 // 2)        # 1.5x headroom
    cp_kwargs = dict(dimension_semantics=("parallel",))
    if vmem_est > (32 << 20):
        # Stay inside v7x's 64 MiB physical VMEM per TensorCore.
        cp_kwargs["vmem_limit_bytes"] = min(vmem_est, 64 << 20)

    kernel = functools.partial(_proposal_discrete_kernel,
                               softmax_boost=float(softmax_boost),
                               valid_out=int(d_out))

    probs_pad = pl.pallas_call(
        kernel,
        out_shape=jax.ShapeDtypeStruct((B_pad, d_out_p), jnp.float32),
        grid_spec=pltpu.PrefetchScalarGridSpec(
            num_scalar_prefetch=0,
            grid=(grid,),
            in_specs=[
                # x tile: pipelined over the batch axis.
                pl.BlockSpec((blk, d_in_p), lambda i: (i, 0)),
                # Grid-invariant weights/biases: whole-array VMEM residents,
                # DMA'd in once (no per-step double-buffering).
                pl.BlockSpec(memory_space=pltpu.MemorySpace.VMEM),   # W1^T bf16
                pl.BlockSpec(memory_space=pltpu.MemorySpace.VMEM),   # b1   f32
                pl.BlockSpec(memory_space=pltpu.MemorySpace.VMEM),   # W2^T bf16
                pl.BlockSpec(memory_space=pltpu.MemorySpace.VMEM),   # b2   f32
            ],
            out_specs=pl.BlockSpec((blk, d_out_p), lambda i: (i, 0)),
        ),
        compiler_params=pltpu.CompilerParams(**cp_kwargs),
    )(x_p, params["w1"], params["b1"], params["w2"], params["b2"])

    return (True, probs_pad[:B, :d_out])


def _init_params(key, input_dim, output_dim):
    """Deterministic parameter init mirroring the module's __init__ shapes.
    lin1.weight: xavier_uniform with gain=calculate_gain('relu')=sqrt(2)."""
    k1, k2, k3, k4 = jax.random.split(key, 4)
    gain = jnp.sqrt(2.0)
    bound1 = gain * jnp.sqrt(6.0 / (input_dim + input_dim))
    w1 = jax.random.uniform(k1, (input_dim, input_dim), jnp.float32,
                            minval=-bound1, maxval=bound1)
    bound2 = 1.0 / jnp.sqrt(float(input_dim))
    w2 = jax.random.uniform(k2, (output_dim, input_dim), jnp.float32,
                            minval=-bound2, maxval=bound2)
    b1 = jax.random.uniform(k3, (input_dim,), jnp.float32,
                            minval=-bound2, maxval=bound2)
    b2 = jax.random.uniform(k4, (output_dim,), jnp.float32,
                            minval=-bound2, maxval=bound2)
    return w1, b1, w2, b2


if __name__ == "__main__":
    B, INPUT_DIM, OUTPUT_DIM = 16, 32, 16
    SOFTMAX_BOOST = 1.0

    key = jax.random.PRNGKey(0)
    kx, kp = jax.random.split(key)
    x = jax.random.normal(kx, (B, INPUT_DIM), jnp.float32)
    w1, b1, w2, b2 = _init_params(kp, INPUT_DIM, OUTPUT_DIM)

    # One-time parameter prep (transpose / lane-pad / bf16) — outside the hot path.
    params = prepare_params(w1, b1, w2, b2)

    ok_flag, probs = proposal_discrete_forward(
        x, params, softmax_boost=SOFTMAX_BOOST)
    probs = jax.block_until_ready(probs)

    # Reference check in plain JAX (f32 end-to-end).
    h_ref = jnp.maximum(x @ w1.T + b1, 0.0)
    ref = jax.nn.softmax((h_ref @ w2.T + b2) * SOFTMAX_BOOST, axis=-1)
    assert ok_flag is True
    assert probs.shape == (B, OUTPUT_DIM)
    # bf16 MXU inputs + approx reciprocal -> relaxed tolerance vs. the f32 reference.
    assert jnp.allclose(probs, ref, atol=2e-2, rtol=2e-2)
    assert jnp.allclose(jnp.sum(probs, axis=-1), 1.0, atol=1e-2)

    print("KERNEL_OK")
</pallas_src>

<mosaic_0001>
module attributes {stable_mosaic.version = 11 : i64} {
  func.func @_proposal_discrete_kernel(%arg0: i32, %arg1: memref<8x128xbf16, #tpu.memory_space<vmem>>, %arg2: memref<128x128xbf16, #tpu.memory_space<vmem>>, %arg3: memref<1x128xf32, #tpu.memory_space<vmem>>, %arg4: memref<128x128xbf16, #tpu.memory_space<vmem>>, %arg5: memref<1x128xf32, #tpu.memory_space<vmem>>, %arg6: memref<8x128xf32, #tpu.memory_space<vmem>>) attributes {dimension_semantics = [#tpu.dimension_semantics<parallel>], iteration_bounds = array<i64: 2>, scalar_prefetch = 0 : i64, scratch_operands = 0 : i64, tpu.core_type = #tpu.core_type<tc>, window_params = [{transform_indices = @transform_0, window_bounds = array<i64: 8, 128>}, {pipeline_mode = #tpu.pipeline_mode<synchronous>, transform_indices = @transform_1, window_bounds = array<i64: 128, 128>}, {pipeline_mode = #tpu.pipeline_mode<synchronous>, transform_indices = @transform_2, window_bounds = array<i64: 1, 128>}, {pipeline_mode = #tpu.pipeline_mode<synchronous>, transform_indices = @transform_3, window_bounds = array<i64: 128, 128>}, {pipeline_mode = #tpu.pipeline_mode<synchronous>, transform_indices = @transform_4, window_bounds = array<i64: 1, 128>}, {transform_indices = @transform_5, window_bounds = array<i64: 8, 128>}]} {
    %c0 = arith.constant 0 : index
    %c0_0 = arith.constant 0 : index
    %0 = vector.load %arg1[%c0, %c0_0] : memref<8x128xbf16, #tpu.memory_space<vmem>>, vector<8x128xbf16>
    %c0_1 = arith.constant 0 : index
    %c0_2 = arith.constant 0 : index
    %1 = vector.load %arg2[%c0_1, %c0_2] : memref<128x128xbf16, #tpu.memory_space<vmem>>, vector<128x128xbf16>
    %cst = arith.constant dense<0.000000e+00> : vector<8x128xf32>
    %2 = tpu.matmul %0, %1, %cst {dimension_numbers = #tpu.dot_dimension_numbers<[1], [0], [0], [1], [0, 0, 1, 1], [], []>} : vector<8x128xbf16>, vector<128x128xbf16>, vector<8x128xf32> -> vector<8x128xf32>
    %c0_3 = arith.constant 0 : index
    %c0_4 = arith.constant 0 : index
    %3 = vector.load %arg3[%c0_3, %c0_4] : memref<1x128xf32, #tpu.memory_space<vmem>>, vector<1x128xf32>
    %4 = vector.broadcast %3 : vector<1x128xf32> to vector<8x128xf32>
    %5 = arith.addf %2, %4 : vector<8x128xf32>
    %cst_5 = arith.constant 0.000000e+00 : f32
    %6 = vector.broadcast %cst_5 : f32 to vector<8x128xf32>
    %7 = arith.maximumf %5, %6 : vector<8x128xf32>
    %8 = arith.truncf %7 : vector<8x128xf32> to vector<8x128xbf16>
    %c0_6 = arith.constant 0 : index
    %c0_7 = arith.constant 0 : index
    %9 = vector.load %arg4[%c0_6, %c0_7] : memref<128x128xbf16, #tpu.memory_space<vmem>>, vector<128x128xbf16>
    %cst_8 = arith.constant dense<0.000000e+00> : vector<8x128xf32>
    %10 = tpu.matmul %8, %9, %cst_8 {dimension_numbers = #tpu.dot_dimension_numbers<[1], [0], [0], [1], [0, 0, 1, 1], [], []>} : vector<8x128xbf16>, vector<128x128xbf16>, vector<8x128xf32> -> vector<8x128xf32>
    %c0_9 = arith.constant 0 : index
    %c0_10 = arith.constant 0 : index
    %11 = vector.load %arg5[%c0_9, %c0_10] : memref<1x128xf32, #tpu.memory_space<vmem>>, vector<1x128xf32>
    %12 = vector.broadcast %11 : vector<1x128xf32> to vector<8x128xf32>
    %13 = arith.addf %10, %12 : vector<8x128xf32>
    %14 = tpu.iota {dimensions = array<i32: 1>} : vector<1x128xi32>
    %c16_i32 = arith.constant 16 : i32
    %15 = vector.broadcast %c16_i32 : i32 to vector<1x128xi32>
    %16 = arith.cmpi slt, %14, %15 : vector<1x128xi32>
    %cst_11 = arith.constant 0xFF800000 : f32
    %17 = vector.shape_cast %16 : vector<1x128xi1> to vector<1x128xi1>
    %18 = vector.broadcast %17 : vector<1x128xi1> to vector<8x128xi1>
    %19 = vector.broadcast %cst_11 : f32 to vector<8x128xf32>
    %20 = arith.select %18, %13, %19 : vector<8x128xi1>, vector<8x128xf32>
    %cst_12 = arith.constant dense<0xFF800000> : vector<8xf32>
    %21 = vector.multi_reduction <maximumf>, %20, %cst_12 [1] : vector<8x128xf32> to vector<8xf32>
    %22 = vector.shape_cast %21 : vector<8xf32> to vector<8x1xf32>
    %23 = vector.broadcast %22 : vector<8x1xf32> to vector<8x128xf32>
    %24 = arith.subf %20, %23 : vector<8x128xf32>
    %25 = math.exp %24 : vector<8x128xf32>
    %cst_13 = arith.constant dense<0.000000e+00> : vector<8xf32>
    %26 = vector.multi_reduction <add>, %25, %cst_13 [1] : vector<8x128xf32> to vector<8xf32>
    %27 = vector.shape_cast %26 : vector<8xf32> to vector<8x1xf32>
    %28 = tpu.reciprocal %27 {approx = true} : vector<8x1xf32> -> vector<8x1xf32>
    %29 = vector.broadcast %28 : vector<8x1xf32> to vector<8x128xf32>
    %30 = arith.mulf %25, %29 : vector<8x128xf32>
    %c0_14 = arith.constant 0 : index
    %c0_15 = arith.constant 0 : index
    %31 = vector.load %arg6[%c0_14, %c0_15] : memref<8x128xf32, #tpu.memory_space<vmem>>, vector<8x128xf32>
    tpu.vector_store %arg6[%c0_14, %c0_15], %30 {strides = array<i32>} : memref<8x128xf32, #tpu.memory_space<vmem>>, vector<8x128xf32>,
    return
  }
  func.func @transform_0(%arg0: i32) -> (i32, i32) {
    %c0_i32 = arith.constant 0 : i32
    %c0_i32_0 = arith.constant 0 : i32
    return %arg0, %c0_i32 : i32, i32
  }
  func.func @transform_1(%arg0: i32) -> (i32, i32) {
    %c0_i32 = arith.constant 0 : i32
    %c0_i32_0 = arith.constant 0 : i32
    %c0_i32_1 = arith.constant 0 : i32
    return %c0_i32, %c0_i32_0 : i32, i32
  }
  func.func @transform_2(%arg0: i32) -> (i32, i32) {
    %c0_i32 = arith.constant 0 : i32
    %c0_i32_0 = arith.constant 0 : i32
    %c0_i32_1 = arith.constant 0 : i32
    return %c0_i32, %c0_i32_0 : i32, i32
  }
  func.func @transform_3(%arg0: i32) -> (i32, i32) {
    %c0_i32 = arith.constant 0 : i32
    %c0_i32_0 = arith.constant 0 : i32
    %c0_i32_1 = arith.constant 0 : i32
    return %c0_i32, %c0_i32_0 : i32, i32
  }
  func.func @transform_4(%arg0: i32) -> (i32, i32) {
    %c0_i32 = arith.constant 0 : i32
    %c0_i32_0 = arith.constant 0 : i32
    %c0_i32_1 = arith.constant 0 : i32
    return %c0_i32, %c0_i32_0 : i32, i32
  }
  func.func @transform_5(%arg0: i32) -> (i32, i32) {
    %c0_i32 = arith.constant 0 : i32
    %c0_i32_0 = arith.constant 0 : i32
    return %arg0, %c0_i32 : i32, i32
  }
}

</mosaic_0001>

<bundles_post_ra>
// kernel: tpu_custom_call.1
= control target key start
LH: loop header
LB: loop body
LE: loop exit
PB: predicated region body
PF: predicated region fallthrough
CT: control target
= control target key end

     0   :  { %10 = vsyncpa [#allocation3], 0  ;;  %s1232_s0 = inlined_call_operand.hbm [shape: bf16[16,128], index: 0, kind: input, shape index: {}]   ;;  %s1233_s1 = inlined_call_operand.hbm [shape: bf16[128,128], index: 1, kind: input, shape index: {}]   ;;  %s1234_s2 = inlined_call_operand.vmem [shape: f32[1,128], index: 2, kind: input, shape index: {}]   ;;  %s1235_s3 = inlined_call_operand.hbm [shape: bf16[128,128], index: 3, kind: input, shape index: {}]   ;;  %s1236_s4 = inlined_call_operand.vmem [shape: f32[1,128], index: 4, kind: input, shape index: {}]   ;;  %s1237_s5 = inlined_call_operand.hbm [shape: f32[16,128], index: 5, kind: output, shape index: {}]  }
   0x1   :  { %12 = vsyncpa [#allocation3 + $0x1], 0 }
   0x2   :  { %13 = vsyncpa [#allocation6], 0 }
   0x3   :  { %14 = vsyncpa [#allocation4], 0 }
   0x4   :  { %16 = vsyncpa [#allocation4 + $0x1], 0  ;;  %s993_s18 = smov 0   ;;  %s995_s19 = smov 0  }
   0x5   :  { %s997_s20 = smov 0   ;;  %s999_s21 = smov 0  }
   0x6 LB: > { %s1014_s22 = sadd.s32 4294967295, %s953_s21   ;;  %s614_s23 = sadd.s32 4294967294, %s953_s21   ;;  %s953_s21 = sphi %s999_s21, %s1257_s21   ;;  %s949_s20 = sphi %s997_s20, %s1256_s20   ;;  %s945_s19 = sphi %s995_s19, %s1255_s19   ;;  %s941_s18 = sphi %s993_s18, %s1254_s18  }
   0x7   : > { %p42_p0 = scmp.ne.s32.totalorder %s945_s19, %s941_s18  ;;  %p1238_p1 = scmp.eq.s32.totalorder %s1014_s22, 0 }
   0x8   : > { %p156_p3 = scmp.eq.s32.totalorder %s614_s23, 1  ;;  %p615_p5 = scmp.ge.s32.totalorder %s953_s21, 1 }
   0x9   : > { %p1023_p4 = por %p1238_p1, %p42_p0  ;;  %p163_p7 = scmp.lt.s32.totalorder %s953_s21, 3 }
   0xa   : > { %p1028_p6 = por %p156_p3, %p42_p0  ;;  %s955_s27 = smov [#allocation5]  }
   0xb   : > { %s1241_s24 = scalar_select %p1023_p4, 1, 0 }
   0xc   : > { %s1242_s25 = scalar_select %p1028_p6, 1, 0 }
   0xd   : > { %p1033_p8 = pnand %p615_p5, %p163_p7  ;;  %s175_s28 = sshll.u32 %s955_s27, 4  ;;  %s1037_s28 = int_to_ptr.vmem [resolvable:$true] %s175_s28 }
   0xe   : > { %s956_s30 = smov [#allocation7]   ;;  %s797_s9 = scalar_lea.hbm %s1233_s1, 1024 }
   0xf   : > { %p718_p9 = pneg %p1033_p8  ;;  %s191_s6 = sshll.u32 %s956_s30, 4  ;;  %s1048_s6 = int_to_ptr.vmem [resolvable:$true] %s191_s6 }
  0x10   : > { %p798_p12 = scmp.ne.s32.totalorder %s1233_s1, %s797_s9  ;;  %p804_p5 = scmp.lt.u32.totalorder %s797_s9, %s1233_s1 }
  0x11   : > { %p1044_p11 = pnand %p718_p9, %p1238_p1 }
  0x13   : > { %p799_p13 = pneg %p1044_p11 }
  0x15   : > { %p800_p0 = pnand %p799_p13, %p798_p12 }
  0x17   : > { %p801_p3 = pneg %p800_p0 }
  0x19   : > { %p806_p7 = pnand %p804_p5, %p801_p3 }
  0x1b   : > { %809 = shalt.err (!%p806_p7)
}
  0x1c   : > { %s810_s14 = scalar_lea.vmem %s1037_s28, 1024  ;;  %p818_p2 = scmp.lt.s32.totalorder %s1037_s28, %s1037_s28 }
  0x1d   : > { %p811_p9 = scmp.ne.s32.totalorder %s1037_s28, %s810_s14  ;;  %p819_p12 = scmp.lt.s32.totalorder %s810_s14, %s810_s14 }
  0x1f   : > { %p813_p10 = pnand %p811_p9, %p799_p13  ;;  %p820_p0 = por %p819_p12, %p818_p2 }
  0x21   : > { %p814_p1 = pneg %p813_p10 }
  0x23   : > { %p821_p6 = pnand %p820_p0, %p814_p1 }
  0x25   : > { %824 = shalt.err (!%p821_p6)
}
  0x26   : > { %s957_s15 = smov 64   ;;  %s958_s16 = smov 4  }
  0x27   : > { %721 = dma.hbm_to_vmem [thread:$0]  (!%p1044_p11), %s1233_s1, 1024, %s1037_s28, [#allocation6], %s957_s15, %s957_s15, %s958_s16  }
  0x28   : > { %s825_s7 = scalar_lea.hbm %s1235_s3, 1024 }
  0x29   : > { %p826_p2 = scmp.ne.s32.totalorder %s1235_s3, %s825_s7  ;;  %p832_p10 = scmp.lt.u32.totalorder %s825_s7, %s1235_s3 }
  0x2b   : > { %p828_p1 = pnand %p826_p2, %p799_p13 }
  0x2d   : > { %p829_p6 = pneg %p828_p1 }
  0x2f   : > { %p834_p3 = pnand %p832_p10, %p829_p6 }
  0x31   : > { %837 = shalt.err (!%p834_p3)
}
  0x32   : > { %s838_s28 = scalar_lea.vmem %s1048_s6, 1024  ;;  %p846_p12 = scmp.lt.s32.totalorder %s1048_s6, %s1048_s6 }
  0x33   : > { %p839_p5 = scmp.ne.s32.totalorder %s1048_s6, %s838_s28  ;;  %p847_p0 = scmp.lt.s32.totalorder %s838_s28, %s838_s28 }
  0x35   : > { %p841_p7 = pnand %p839_p5, %p799_p13  ;;  %p848_p2 = por %p847_p0, %p846_p12 }
  0x37   : > { %p842_p9 = pneg %p841_p7 }
  0x39   : > { %p849_p1 = pnand %p848_p2, %p842_p9 }
  0x3b   : > { %852 = shalt.err (!%p849_p1)
}
  0x3c   : > { %724 = dma.hbm_to_vmem [thread:$0]  (!%p1044_p11), %s1235_s3, 1024, %s1048_s6, [#allocation6], %s957_s15, %s957_s15, %s958_s16  }
  0x3d   : > { %s1103_s14 = sadd.s32 1, %s953_s21   ;;  %s29_s29 = sadd.s32 1, %s949_s20 }
  0x3e   : > { %s26_s17 = ssub.s32 %s953_s21, %s1103_s14  ;;  %p36_p13 = scmp.ne.s32.totalorder %s949_s20, %s945_s19 }
  0x3f   : > { %p27_p6 = scmp.eq.s32.totalorder %s26_s17, 0  ;;  %p37_p10 = scmp.eq.s32.totalorder %s953_s21, 0 }
  0x40   : > { %p1245_p3 = scmp.eq.s32.totalorder %s1014_s22, 1  ;;  %p735_p7 = scmp.lt.s32.totalorder %s953_s21, 2 }
  0x41   : > { %s1119_s27 = scalar_select %p27_p6, %s949_s20, %s29_s29  }
  0x42   : > { %p1113_p5 = por %p1245_p3, %p36_p13  ;;  %p38_p9 = por %p37_p10, %p36_p13 }
  0x43   : > { %s208_s30 = sand.u32 1, %s949_s20   ;;  %s620_s6 = sshll.u32 %s953_s21, 6 }
  0x44   : > { %s1246_s23 = scalar_select %p1113_p5, 1, 0 }
  0x45   : > { %s619_s7 = sshll.u32 %s208_s30, 2  ;;  %s1126_s8 = scalar_lea.hbm %s1232_s0, %s620_s6 }
  0x46   : > { %s212_s9 = scalar_lea.vmem [#allocation2], %s619_s7  ;;  %p1130_p11 = pnand %p735_p7, %p38_p9 }
  0x47   : > { %s219_s10 = sshll.u32 %s212_s9, 4  ;;  %s209_s28 = scalar_lea.sflag [#allocation3], %s208_s30  ;;  %s1128_s10 = int_to_ptr.vmem [resolvable:$true] %s219_s10 }
  0x48   : > { %s853_s12 = scalar_lea.hbm %s1126_s8, 64  ;;  %p855_p0 = pneg %p1130_p11 }
  0x49   : > { %p854_p12 = scmp.ne.s32.totalorder %s1126_s8, %s853_s12  ;;  %s858_s17 = scalar_lea.hbm %s1232_s0, 128 }
  0x4a   : > { %p859_p13 = scmp.lt.u32.totalorder %s1126_s8, %s1232_s0  ;;  %p860_p6 = scmp.lt.u32.totalorder %s858_s17, %s853_s12 }
  0x4b   : > { %p856_p2 = pnand %p855_p0, %p854_p12  ;;  %p862_p3 = scmp.lt.u32.totalorder %s853_s12, %s1126_s8 }
  0x4c   : > { %p861_p10 = por %p860_p6, %p859_p13 }
  0x4d   : > { %p857_p1 = pneg %p856_p2 }
  0x4e   : > { %p863_p7 = por %p862_p3, %p861_p10 }
  0x50   : > { %p864_p9 = pnand %p863_p7, %p857_p1 }
  0x52   : > { %867 = shalt.err (!%p864_p9)
}
  0x53   : > { %s868_s30 = scalar_lea.vmem %s1128_s10, 64  ;;  %s959_s15 = smov [#allocation2]  }
  0x54   : > { %p869_p12 = scmp.ne.s32.totalorder %s1128_s10, %s868_s30  ;;  %s873_s16 = sshll.u32 %s959_s15, 4  ;;  %s874_s16 = int_to_ptr.vmem [resolvable:$false] %s873_s16 }
  0x55   : > { %s875_s9 = scalar_lea.vmem %s874_s16, 128  ;;  %p876_p4 = scmp.lt.s32.totalorder %s1128_s10, %s874_s16 }
  0x56   : > { %p871_p2 = pnand %p869_p12, %p855_p0  ;;  %p877_p13 = scmp.lt.s32.totalorder %s875_s9, %s868_s30 }
  0x58   : > { %p872_p5 = pneg %p871_p2  ;;  %p878_p6 = por %p877_p13, %p876_p4 }
  0x5a   : > { %p879_p10 = pnand %p878_p6, %p872_p5 }
  0x5c   : > { %882 = shalt.err (!%p879_p10)
}
  0x5d   : > { %728 = dma.hbm_to_vmem [thread:$0]  (!%p1130_p11), %s1126_s8, 64, %s1128_s10, %s209_s28  }
  0x5e   : > { %228 = sbr.rel (%p1033_p8) target bundleno = 898 (0x382), region = 40  ;;  %s1162_s12 = sand.u32 (!%p1033_p8), 1, %s945_s19  }
  0x5f   : > { %s622_s13 = sshll.u32 (!%p1033_p8), %s1162_s12, 2  ;;  %s231_s29 = scalar_lea.sflag (!%p1033_p8), [#allocation3], %s1162_s12 }
  0x60   : > { %s1166_s17 = scalar_lea.vmem (!%p1033_p8), [#allocation2], %s622_s13  ;;  %p1248_p4 = scmp.ne.s32.totalorder (!%p1033_p8), %s1241_s24, 0 }
  0x65   : > { %928 = dma.done.wait (%p1248_p4), %s231_s29, 64  }
  0x66   : > { %930 = vsyncadd (%p1248_p4), %s231_s29, 4294967232  ;;  %p1249_p5 = scmp.eq.s32.totalorder %s1014_s22, 0 }
  0x68   : > { %932 = dma.done.wait (%p1249_p5), [#allocation6], 2048   ;;  %p1250_p8 = pmov %p1249_p5 }
  0x69   : > { %v960_v0 = vmov 0.0   ;;  %vm961_vm0 = vmmov 0   ;;  %v777_v1 = vld [vmem:[#allocation5] sm:$0xff]   ;;  %v778_v2 = vld [vmem:[#allocation5 + $0x8] sm:$0xff]   ;;  %v779_v3 = vld [vmem:[#allocation5 + $0x10] sm:$0xff]   ;;  %v495_v26 = vlaneseq  ;;  %s625_s11 = sshll.u32 %s1162_s12, 3 }
  0x6a   : > { %934 = vsyncadd (%p1250_p8), [#allocation6], 4294965248  ;;  %666 = vmatprep.subr.bf16.mxu0 %v960_v0  ;;  %682 = vmatprep.mubr.msk.bf16.mxu0 %vm961_vm0, %v960_v0  ;;  %v785_v4 = vld [vmem:[#allocation7] sm:$0xff]   ;;  %v780_v5 = vld [vmem:[#allocation5 + $0x18] sm:$0xff]   ;;  %s645_s28 = sshll.u32 %s1014_s22, 7  ;;  %s268_s7 = scalar_lea.vmem [#allocation8], %s625_s11 }
  0x6b   : > { %686 = vmatprep.subr.bf16.mxu1 %v960_v0  ;;  %702 = vmatprep.mubr.msk.bf16.mxu1 %vm961_vm0, %v960_v0  ;;  %v786_v6 = vld [vmem:[#allocation7 + $0x8] sm:$0xff]   ;;  %v781_v7 = vld [vmem:[#allocation5 + $0x20] sm:$0xff]   ;;  %v787_v8 = vld [vmem:[#allocation7 + $0x10] sm:$0xff]   ;;  %v496_v27 = vand.u32 127, %v495_v26  ;;  %s525_s6 = sshll.u32 %s268_s7, 4  ;;  %s1188_s16 = scalar_lea.hbm %s1237_s5, %s645_s28  ;;  %s1190_s6 = int_to_ptr.vmem [resolvable:$true] %s525_s6 }
  0x6c   : > { %667 = vmatpush3.bf16.msra.mxu0 %v777_v1  ;;  %687 = vmatpush3.bf16.msra.mxu1 %v785_v4  ;;  %v782_v9 = vld [vmem:[#allocation5 + $0x28] sm:$0xff]   ;;  %v788_v10 = vld [vmem:[#allocation7 + $0x18] sm:$0xff]   ;;  %v783_v11 = vld [vmem:[#allocation5 + $0x30] sm:$0xff]   ;;  %s512_s9 = scalar_lea.sflag [#allocation4], %s1162_s12  ;;  %s883_s13 = scalar_lea.vmem %s1190_s6, 128 }
  0x6d   : > { %668 = vmatprep.subr.bf16.mxu0 %v960_v0  ;;  %688 = vmatprep.subr.bf16.mxu1 %v960_v0  ;;  %v789_v12 = vld [vmem:[#allocation7 + $0x20] sm:$0xff]   ;;  %v784_v13 = vld [vmem:[#allocation5 + $0x38] sm:$0xff]   ;;  %v790_v14 = vld [vmem:[#allocation7 + $0x28] sm:$0xff]   ;;  %vm497_vm1 = vcmp.lt.s32.totalorder %v496_v27, 16  ;;  %p884_p11 = scmp.ne.s32.totalorder %s1190_s6, %s883_s13  ;;  %p1251_p0 = scmp.ne.s32.totalorder %s1246_s23, 0 }
  0x6e   : > { %v270_v15 = vld [vmem:[%s1166_s17] sm:$0xf]  ;;  %v791_v16 = vld [vmem:[#allocation7 + $0x30] sm:$0xff]   ;;  %s962_s22 = smov [#allocation8]  }
  0x6f   : > { %v792_v17 = vld [vmem:[#allocation7 + $0x38] sm:$0xff]   ;;  %p885_p1 = pnand %p884_p11, %p1251_p0  ;;  %s887_s29 = sshll.u32 %s962_s22, 4  ;;  %s888_s29 = int_to_ptr.vmem [resolvable:$false] %s887_s29 }
  0x70   : > { %669 = vmatpush3.bf16.msra.mxu0 %v778_v2  ;;  %689 = vmatpush3.bf16.msra.mxu1 %v786_v6  ;;  %v626_v18 = vld [vmem:[%s1234_s2] ss:$0 sm:$0xff]  ;;  %s889_s17 = scalar_lea.vmem %s888_s29, 256  ;;  %p890_p7 = scmp.lt.s32.totalorder %s1190_s6, %s888_s29 }
  0x71   : > { %670 = vmatprep.subr.bf16.mxu0 %v960_v0  ;;  %690 = vmatprep.subr.bf16.mxu1 %v960_v0  ;;  %v635_v28 = vld [vmem:[%s1236_s4] ss:$0 sm:$0xff]  ;;  %p886_p3 = pneg %p885_p1  ;;  %p891_p9 = scmp.lt.s32.totalorder %s889_s17, %s883_s13 }
  0x73   : > { %p892_p12 = por %p891_p9, %p890_p7 }
  0x74   : > { %671 = vmatpush3.bf16.msra.mxu0 %v779_v3  ;;  %691 = vmatpush3.bf16.msra.mxu1 %v787_v8 }
  0x75   : > { %672 = vmatprep.subr.bf16.mxu0 %v960_v0  ;;  %692 = vmatprep.subr.bf16.mxu1 %v960_v0  ;;  %p893_p2 = pnand %p892_p12, %p886_p3 }
  0x78   : > { %673 = vmatpush3.bf16.msra.mxu0 %v780_v5  ;;  %693 = vmatpush3.bf16.msra.mxu1 %v788_v10 }
  0x79   : > { %674 = vmatprep.subr.bf16.mxu0 %v960_v0  ;;  %694 = vmatprep.subr.bf16.mxu1 %v960_v0 }
  0x7c   : > { %675 = vmatpush3.bf16.msra.mxu0 %v781_v7  ;;  %695 = vmatpush3.bf16.msra.mxu1 %v789_v12 }
  0x7d   : > { %676 = vmatprep.subr.bf16.mxu0 %v960_v0  ;;  %696 = vmatprep.subr.bf16.mxu1 %v960_v0 }
  0x80   : > { %677 = vmatpush3.bf16.msra.mxu0 %v782_v9  ;;  %697 = vmatpush3.bf16.msra.mxu1 %v790_v14 }
  0x81   : > { %678 = vmatprep.subr.bf16.mxu0 %v960_v0  ;;  %698 = vmatprep.subr.bf16.mxu1 %v960_v0 }
  0x84   : > { %679 = vmatpush3.bf16.msra.mxu0 %v783_v11  ;;  %699 = vmatpush3.bf16.msra.mxu1 %v791_v16 }
  0x85   : > { %680 = vmatprep.subr.bf16.mxu0 %v960_v0  ;;  %700 = vmatprep.subr.bf16.mxu1 %v960_v0 }
  0x88   : > { %681 = vmatpush3.bf16.msra.mxu0 %v784_v13  ;;  %701 = vmatpush3.bf16.msra.mxu1 %v792_v17 }
  0x8b   : > { %683 = vmatmul.mubr.bf16.vlgmr.msra.gmra.mrb[0].mxu0 %v270_v15 }
 0x15e   : > { %v376_v19 = vpop.f32.mrb[0].mxu0 }
 0x15f   : > { %v377_v20 = vadd.f32 %v626_v18, %v376_v19  ;;  %v684_v21 = vpop.f32.mrb[1].mxu0 }
 0x160   : > { %v379_v22 = vpop.f32.mrb[2].mxu0 }
 0x161   : > { %v382_v23 = vmax.f32 %v377_v20, 0.0  ;;  %v685_v24 = vpop.f32.mrb[3].mxu0 }
 0x163   : > { %v383_v25 = vpack.c.bf16 %v382_v23, %v382_v23 }
 0x165   : > { %703 = vmatmul.mubr.bf16.vlgmr.msra.gmra.mrb[0].mxu1 %v383_v25 }
 0x238   : > { %v489_v29 = vpop.f32.mrb[0].mxu1 }
 0x239   : > { %v490_v30 = vadd.f32 %v635_v28, %v489_v29  ;;  %v704_v31 = vpop.f32.mrb[1].mxu1 }
 0x23a   : > { %v492_v32 = vpop.f32.mrb[2].mxu1 }
 0x23b   : > { %v705_v33 = vpop.f32.mrb[3].mxu1  ;;  %v500_v34 = vsel %vm497_vm1, %v490_v30, -inf }
 0x23c   : > { %501 = vmax.xlane.f32.xlu0 %v500_v34 }
 0x2c9   : > { %v502_v35 = vpop.xlane.xlu0 %501 }
 0x2ca   : > { %v503_v36 = vsub.f32 %v500_v34, %v502_v35 }
 0x2cc   : > { %v504_v37 = vmul.f32 1.442695, %v503_v36 }
 0x2ce   : > { %793 = vpow2.f32 %v504_v37 }
 0x2d8   : > { %v794_v38 = vpop.eup %793 }
 0x2d9   : > { %506 = vadd.xlane.f32.xlu0 %v794_v38 }
 0x366   : > { %v507_v39 = vpop.xlane.xlu0 %506 }
 0x367   : > { %795 = vrcp.f32 %v507_v39 }
 0x371   : > { %v796_v40 = vpop.eup %795 }
 0x372   : > { %v509_v41 = vmul.f32 %v796_v40, %v794_v38 }
 0x374   : > { %510 = vst [vmem:[%s268_s7] sm:$0xff] %v509_v41 }
 0x375   : > { %896 = shalt.err (!%p893_p2)
}
 0x376   : > { %s897_s12 = scalar_lea.hbm %s1188_s16, 128  ;;  %s901_s8 = scalar_lea.hbm %s1237_s5, 256 }
 0x377   : > { %p898_p13 = scmp.ne.s32.totalorder %s1188_s16, %s897_s12  ;;  %p902_p4 = scmp.lt.u32.totalorder %s1188_s16, %s1237_s5 }
 0x378   : > { %p903_p5 = scmp.lt.u32.totalorder %s901_s8, %s897_s12  ;;  %p905_p11 = scmp.lt.u32.totalorder %s897_s12, %s1188_s16 }
 0x379   : > { %p899_p6 = pnand %p898_p13, %p1251_p0 }
 0x37a   : > { %p904_p8 = por %p903_p5, %p902_p4 }
 0x37b   : > { %p900_p10 = pneg %p899_p6 }
 0x37c   : > { %p906_p1 = por %p905_p11, %p904_p8 }
 0x37e   : > { %p907_p3 = pnand %p906_p1, %p900_p10 }
 0x380   : > { %910 = shalt.err (!%p907_p3)
}
 0x381   : > { %716 = dma.vmem_to_hbm [thread:$0]  (%p1251_p0), %s1190_s6, 128, %s1188_s16, %s512_s9  }
 0x382 PF: > { %s537_s28 = sand.u32 1, %s941_s18   ;;  %p1252_p7 = scmp.ne.s32.totalorder %s1242_s25, 0 }
 0x383   : > { %p1253_p9 = scmp.ge.s32.totalorder %s953_s21, 2  ;;  %s538_s7 = scalar_lea.sflag [#allocation4], %s537_s28 }
 0x385   : > { %p730_p12 = pnand %p1253_p9, %p1252_p7 }
 0x387   : > { %936 = dma.done.wait (!%p730_p12), %s538_s7, 128  }
 0x388   : > { %938 = vsyncadd (!%p730_p12), %s538_s7, 4294967168  ;;  %p19_p2 = scmp.ge.s32.totalorder %s1103_s14, 4   ;;  %s1254_s18 = smov %s945_s19 }
 0x389   : > { %s1255_s19 = smov %s949_s20  ;;  %s1256_s20 = smov %s1119_s27 }
 0x38a   : > { %s1257_s21 = smov %s1103_s14  ;;  %21 = sbr.rel (!%p19_p2) target bundleno = 6 (0x6), region = 93 }
 0x391   :  { %543 = vsyncpa [#allocation3], 1 }
 0x392   :  { %545 = vsyncpa [#allocation3 + $0x1], 1 }
 0x393   :  { %546 = vsyncpa [#allocation6], 1 }
 0x394   :  { %547 = vsyncpa [#allocation4], 1 }
 0x395   :  { %549 = vsyncpa [#allocation4 + $0x1], 1 }

</bundles_post_ra>
